<compile_context>
chip_gen: v7x
topology: tpu7x:2x2x1
jax: 0.10.0
libtpu: 0.0.40
codegen_flags: <defaults>
</compile_context>

<pallas_src>
import jax
import jax.numpy as jnp
from jax.experimental import pallas as pl
from jax.experimental.pallas import tpu as pltpu

_HIDDEN = 200        # torch hidden size
_HIDDEN_PAD = 256    # padded to a lane multiple (multiple of 128)
_NEG_SLOPE = 0.01    # torch F.leaky_relu default


def _mlp_kernel(x_ref, w1_ref, b1_ref, w2_ref, b2_ref, o_ref):
    # x_ref : (TM, D)   f32 batch tile (streamed / double-buffered)
    # w1_ref: (D, 256)  bf16 fc1 weight (transposed, zero-padded), resident
    # b1_ref: (1, 256)  f32 fc1 bias (zero-padded), resident
    # w2_ref: (1, 256)  f32 fc2 weight row (zero-padded), resident
    # b2_ref: (1, 1)    f32 fc2 bias, scalar in SMEM
    # o_ref : (TM, 1)   f32 output tile
    x = x_ref[...].astype(jnp.bfloat16)

    # fc1 on the MXU: bf16 operands, f32 accumulation.
    h = jnp.dot(x, w1_ref[...], preferred_element_type=jnp.float32) + b1_ref[...]

    # leaky_relu (torch default negative_slope = 0.01), f32 on the VPU.
    h = jnp.where(h > 0, h, _NEG_SLOPE * h)

    # dropout: eval-mode identity.

    # fc2: avoid an N=1 MXU matmul -> VPU multiply + lane reduction (XLU).
    # Padded hidden columns are exactly zero (b1 pad = 0, w2 pad = 0).
    out = jnp.sum(h * w2_ref[...], axis=-1, keepdims=True) + b2_ref[0, 0]
    o_ref[...] = out.astype(o_ref.dtype)


def prepare_params(w1, b1, w2, b2, hidden_pad=_HIDDEN_PAD):
    """One-time weight prep (transpose / pad / cast), hoisted out of the forward."""
    hidden, _ = w1.shape
    pad = hidden_pad - hidden
    w1_t = jnp.pad(w1.T, ((0, 0), (0, pad))).astype(jnp.bfloat16)        # (D, 256)
    b1_p = jnp.pad(b1, (0, pad)).reshape(1, hidden_pad).astype(jnp.float32)
    w2_r = jnp.pad(w2.reshape(1, hidden), ((0, 0), (0, pad))).astype(jnp.float32)
    b2_s = b2.reshape(1, 1).astype(jnp.float32)
    return w1_t, b1_p, w2_r, b2_s


def _round_up(n, m):
    return ((n + m - 1) // m) * m


@jax.jit
def mlp_forward(x, w1_t, b1_p, w2_r, b2_s):
    """x: (B, H, W) float32. Returns (B, 1) float32."""
    b = x.shape[0]
    x_flat = x.reshape(b, -1)            # matches torch x.view(B, -1)
    d = x_flat.shape[1]
    hp = w1_t.shape[1]

    # Batch tile: large enough for pipelining, capped so double-buffered x
    # stays tiny even under v7x's 64 MiB VMEM (TM=1024, D=256 f32 -> 1 MiB/buf).
    tm = min(1024, _round_up(b, 8))
    b_pad = _round_up(b, tm)
    if b_pad != b:
        x_flat = jnp.pad(x_flat, ((0, b_pad - b), (0, 0)))
    grid = (b_pad // tm,)

    out = pl.pallas_call(
        _mlp_kernel,
        out_shape=jax.ShapeDtypeStruct((b_pad, 1), jnp.float32),
        grid_spec=pltpu.PrefetchScalarGridSpec(
            num_scalar_prefetch=0,
            grid=grid,
            in_specs=[
                pl.BlockSpec((tm, d), lambda i: (i, 0)),              # x: streamed
                pl.BlockSpec((d, hp), lambda i: (0, 0)),              # w1: resident
                pl.BlockSpec((1, hp), lambda i: (0, 0)),              # b1: resident
                pl.BlockSpec((1, hp), lambda i: (0, 0)),              # w2 row: resident
                pl.BlockSpec(memory_space=pltpu.MemorySpace.SMEM),    # b2: SMEM scalar
            ],
            out_specs=pl.BlockSpec((tm, 1), lambda i: (i, 0)),
        ),
        compiler_params=pltpu.CompilerParams(
            dimension_semantics=("parallel",),
            vmem_limit_bytes=32 * 1024 * 1024,
        ),
    )(x_flat, w1_t, b1_p, w2_r, b2_s)
    return out[:b]


def init_params(key, in_features, hidden=_HIDDEN, out_features=1):
    """Deterministic init mimicking nn.Linear default (uniform +/- 1/sqrt(fan_in))."""
    k1, k2, k3, k4 = jax.random.split(key, 4)
    lim1 = 1.0 / jnp.sqrt(jnp.float32(in_features))
    lim2 = 1.0 / jnp.sqrt(jnp.float32(hidden))
    w1 = jax.random.uniform(k1, (hidden, in_features), jnp.float32, -lim1, lim1)
    b1 = jax.random.uniform(k2, (hidden,), jnp.float32, -lim1, lim1)
    w2 = jax.random.uniform(k3, (out_features, hidden), jnp.float32, -lim2, lim2)
    b2 = jax.random.uniform(k4, (out_features,), jnp.float32, -lim2, lim2)
    return w1, b1, w2, b2


if __name__ == "__main__":
    key = jax.random.PRNGKey(0)
    kx, kp = jax.random.split(key)

    B, H, W = 2, 16, 16                      # MLP(x=16, y=16, prob=0.5)
    x = jax.random.normal(kx, (B, H, W), jnp.float32)
    w1, b1, w2, b2 = init_params(kp, H * W)

    params = prepare_params(w1, b1, w2, b2)  # hoisted, one-time prep
    out = mlp_forward(x, *params)
    out = jax.block_until_ready(out)

    # Pure-JAX f32 reference (eval-mode dropout = identity).
    x_flat = x.reshape(B, -1)
    h_ref = x_flat @ w1.T + b1
    h_ref = jnp.where(h_ref > 0, h_ref, 0.01 * h_ref)
    ref = h_ref @ w2.T + b2
    assert out.shape == (B, 1)
    # bf16 fc1 operands (f32 accumulation) -> slightly looser tolerance than pure f32.
    assert jnp.allclose(out, ref, atol=3e-2, rtol=3e-2), (out, ref)

    print("KERNEL_OK")
</pallas_src>

<mosaic_0001>
module attributes {stable_mosaic.version = 11 : i64} {
  func.func @_mlp_kernel(%arg0: i32, %arg1: memref<8x256xf32, #tpu.memory_space<vmem>>, %arg2: memref<256x256xbf16, #tpu.memory_space<vmem>>, %arg3: memref<1x256xf32, #tpu.memory_space<vmem>>, %arg4: memref<1x256xf32, #tpu.memory_space<vmem>>, %arg5: memref<1x1xf32, #tpu.memory_space<smem>>, %arg6: memref<8x1xf32, #tpu.memory_space<vmem>>) attributes {dimension_semantics = [#tpu.dimension_semantics<parallel>], iteration_bounds = array<i64: 1>, scalar_prefetch = 0 : i64, scratch_operands = 0 : i64, tpu.core_type = #tpu.core_type<tc>, window_params = [{transform_indices = @transform_0, window_bounds = array<i64: 8, 256>}, {pipeline_mode = #tpu.pipeline_mode<synchronous>, transform_indices = @transform_1, window_bounds = array<i64: 256, 256>}, {pipeline_mode = #tpu.pipeline_mode<synchronous>, transform_indices = @transform_2, window_bounds = array<i64: 1, 256>}, {pipeline_mode = #tpu.pipeline_mode<synchronous>, transform_indices = @transform_3, window_bounds = array<i64: 1, 256>}, {transform_indices = @transform_4, window_bounds = array<i64: 1, 1>}, {transform_indices = @transform_5, window_bounds = array<i64: 8, 1>}]} {
    %c0 = arith.constant 0 : index
    %c0_0 = arith.constant 0 : index
    %0 = vector.load %arg1[%c0, %c0_0] : memref<8x256xf32, #tpu.memory_space<vmem>>, vector<8x256xf32>
    %1 = arith.truncf %0 : vector<8x256xf32> to vector<8x256xbf16>
    %c0_1 = arith.constant 0 : index
    %c0_2 = arith.constant 0 : index
    %2 = vector.load %arg2[%c0_1, %c0_2] : memref<256x256xbf16, #tpu.memory_space<vmem>>, vector<256x256xbf16>
    %cst = arith.constant dense<0.000000e+00> : vector<8x256xf32>
    %3 = tpu.matmul %1, %2, %cst {dimension_numbers = #tpu.dot_dimension_numbers<[1], [0], [0], [1], [0, 0, 1, 1], [], []>} : vector<8x256xbf16>, vector<256x256xbf16>, vector<8x256xf32> -> vector<8x256xf32>
    %c0_3 = arith.constant 0 : index
    %c0_4 = arith.constant 0 : index
    %4 = vector.load %arg3[%c0_3, %c0_4] : memref<1x256xf32, #tpu.memory_space<vmem>>, vector<1x256xf32>
    %5 = vector.broadcast %4 : vector<1x256xf32> to vector<8x256xf32>
    %6 = arith.addf %3, %5 : vector<8x256xf32>
    %cst_5 = arith.constant 0.000000e+00 : f32
    %7 = vector.broadcast %cst_5 : f32 to vector<8x256xf32>
    %8 = arith.cmpf ogt, %6, %7 : vector<8x256xf32>
    %cst_6 = arith.constant 0.00999999977 : f32
    %9 = vector.broadcast %cst_6 : f32 to vector<8x256xf32>
    %10 = arith.mulf %9, %6 : vector<8x256xf32>
    %11 = arith.select %8, %6, %10 : vector<8x256xi1>, vector<8x256xf32>
    %c0_7 = arith.constant 0 : index
    %c0_8 = arith.constant 0 : index
    %12 = vector.load %arg4[%c0_7, %c0_8] : memref<1x256xf32, #tpu.memory_space<vmem>>, vector<1x256xf32>
    %13 = vector.broadcast %12 : vector<1x256xf32> to vector<8x256xf32>
    %14 = arith.mulf %11, %13 : vector<8x256xf32>
    %cst_9 = arith.constant dense<0.000000e+00> : vector<8xf32>
    %15 = vector.multi_reduction <add>, %14, %cst_9 [1] : vector<8x256xf32> to vector<8xf32>
    %16 = vector.shape_cast %15 : vector<8xf32> to vector<8x1xf32>
    %c0_10 = arith.constant 0 : index
    %c0_11 = arith.constant 0 : index
    %17 = memref.load %arg5[%c0_10, %c0_11] : memref<1x1xf32, #tpu.memory_space<smem>>
    %18 = vector.broadcast %17 : f32 to vector<8x1xf32>
    %19 = arith.addf %16, %18 : vector<8x1xf32>
    %c0_12 = arith.constant 0 : index
    %c0_13 = arith.constant 0 : index
    %20 = vector.load %arg6[%c0_12, %c0_13] : memref<8x1xf32, #tpu.memory_space<vmem>>, vector<8x1xf32>
    tpu.vector_store %arg6[%c0_12, %c0_13], %19 {strides = array<i32>} : memref<8x1xf32, #tpu.memory_space<vmem>>, vector<8x1xf32>,
    return
  }
  func.func @transform_0(%arg0: i32) -> (i32, i32) {
    %c0_i32 = arith.constant 0 : i32
    %c0_i32_0 = arith.constant 0 : i32
    return %arg0, %c0_i32 : i32, i32
  }
  func.func @transform_1(%arg0: i32) -> (i32, i32) {
    %c0_i32 = arith.constant 0 : i32
    %c0_i32_0 = arith.constant 0 : i32
    %c0_i32_1 = arith.constant 0 : i32
    return %c0_i32, %c0_i32_0 : i32, i32
  }
  func.func @transform_2(%arg0: i32) -> (i32, i32) {
    %c0_i32 = arith.constant 0 : i32
    %c0_i32_0 = arith.constant 0 : i32
    %c0_i32_1 = arith.constant 0 : i32
    return %c0_i32, %c0_i32_0 : i32, i32
  }
  func.func @transform_3(%arg0: i32) -> (i32, i32) {
    %c0_i32 = arith.constant 0 : i32
    %c0_i32_0 = arith.constant 0 : i32
    %c0_i32_1 = arith.constant 0 : i32
    return %c0_i32, %c0_i32_0 : i32, i32
  }
  func.func @transform_4(%arg0: i32) -> (i32, i32) {
    %c0_i32 = arith.constant 0 : i32
    %c0_i32_0 = arith.constant 0 : i32
    %c0_i32_1 = arith.constant 0 : i32
    return %c0_i32, %c0_i32_0 : i32, i32
  }
  func.func @transform_5(%arg0: i32) -> (i32, i32) {
    %c0_i32 = arith.constant 0 : i32
    %c0_i32_0 = arith.constant 0 : i32
    return %arg0, %c0_i32 : i32, i32
  }
}

</mosaic_0001>

<bundles_post_ra>
// kernel: mlp_forward.1
= control target key start
LH: loop header
LB: loop body
LE: loop exit
PB: predicated region body
PF: predicated region fallthrough
CT: control target
= control target key end

     0   :  { %11 = vsyncpa [#allocation4], 0  ;;  %s424_s18 = smov [#allocation3]   ;;  %s487_s0 = inlined_call_operand.vmem [shape: f32[8,256], index: 0, kind: input, shape index: {}]   ;;  %s488_s1 = inlined_call_operand.hbm [shape: bf16[256,256], index: 1, kind: input, shape index: {}]   ;;  %s489_s2 = inlined_call_operand.vmem [shape: f32[1,256], index: 2, kind: input, shape index: {}]   ;;  %s490_s3 = inlined_call_operand.vmem [shape: f32[1,256], index: 3, kind: input, shape index: {}]   ;;  %s491_s4 = inlined_call_operand.<no memory space> [shape: f32[1,1], index: 4, kind: input, shape index: {}]   ;;  %s492_s5 = inlined_call_operand.vmem [shape: f32[8,1], index: 5, kind: output, shape index: {}]  }
   0x1   :  { %s19_s19 = sshll.u32 %s424_s18, 4  ;;  %s400_s22 = scalar_lea.hbm %s488_s1, 4096  ;;  %s20_s19 = int_to_ptr.vmem [resolvable:$true] %s19_s19 }
   0x2   :  { %p401_p0 = scmp.ne.s32.totalorder %s488_s1, %s400_s22  ;;  %p404_p1 = scmp.lt.u32.totalorder %s400_s22, %s488_s1 }
   0x4   :  { %p406_p2 = pnand %p404_p1, %p401_p0 }
   0x6   :  { %409 = shalt.err (!%p406_p2)
}
   0x7   :  { %s410_s27 = scalar_lea.vmem %s20_s19, 4096  ;;  %p415_p4 = scmp.lt.s32.totalorder %s20_s19, %s20_s19 }
   0x8   :  { %p411_p3 = scmp.ne.s32.totalorder %s20_s19, %s410_s27  ;;  %p416_p5 = scmp.lt.s32.totalorder %s410_s27, %s410_s27 }
   0xa   :  { %p417_p6 = por %p416_p5, %p415_p4 }
   0xc   :  { %p418_p7 = pnand %p417_p6, %p411_p3 }
   0xe   :  { %421 = shalt.err (!%p418_p7)
}
   0xf   :  { %s425_s28 = smov 128   ;;  %s426_s29 = smov 8  }
  0x10   :  { %25 = dma.hbm_to_vmem [thread:$0]  %s488_s1, 4096, %s20_s19, [#allocation4], %s425_s28, %s425_s28, %s426_s29  }
  0x11   :  { %422 = dma.done.wait [#allocation4], 4096  }
  0x12   :  { %423 = vsyncadd [#allocation4], 4294963200  ;;  %v352_v0 = vld [vmem:[#allocation3 + $0x4] ss:$8 sps:$4 sm:$0xff]   ;;  %v354_v1 = vld [vmem:[#allocation3] ss:$8 sps:$4 sm:$0xff]   ;;  %v73_v36 = vlaneseq  ;;  %v308_v59 = vstv %s491_s4 }
  0x13   :  { %243 = vmatprep.subr.bf16.mxu0 %v352_v0  ;;  %v355_v2 = vld [vmem:[#allocation3 + $0x14] ss:$8 sps:$4 sm:$0xff]   ;;  %v357_v3 = vld [vmem:[#allocation3 + $0x10] ss:$8 sps:$4 sm:$0xff]   ;;  %v358_v4 = vld [vmem:[#allocation3 + $0x24] ss:$8 sps:$4 sm:$0xff]  }
  0x14   :  { %244 = vmatpush1.bf16.msra.mxu0 %v354_v1  ;;  %v360_v5 = vld [vmem:[#allocation3 + $0x20] ss:$8 sps:$4 sm:$0xff]   ;;  %v361_v6 = vld [vmem:[#allocation3 + $0x34] ss:$8 sps:$4 sm:$0xff]   ;;  %v363_v7 = vld [vmem:[#allocation3 + $0x30] ss:$8 sps:$4 sm:$0xff]  }
  0x15   :  { %245 = vmatprep.subr.bf16.mxu0 %v355_v2  ;;  %v364_v8 = vld [vmem:[#allocation3 + $0x44] ss:$8 sps:$4 sm:$0xff]   ;;  %v366_v9 = vld [vmem:[#allocation3 + $0x40] ss:$8 sps:$4 sm:$0xff]   ;;  %v367_v10 = vld [vmem:[#allocation3 + $0x54] ss:$8 sps:$4 sm:$0xff]  }
  0x16   :  { %v369_v11 = vld [vmem:[#allocation3 + $0x50] ss:$8 sps:$4 sm:$0xff]   ;;  %v370_v12 = vld [vmem:[#allocation3 + $0x64] ss:$8 sps:$4 sm:$0xff]   ;;  %v372_v15 = vld [vmem:[#allocation3 + $0x60] ss:$8 sps:$4 sm:$0xff]  }
  0x17   :  { %v36_v13 = vld [vmem:[%s487_s0 + $0x8] sm:$0xff]  ;;  %v373_v16 = vld [vmem:[#allocation3 + $0x74] ss:$8 sps:$4 sm:$0xff]   ;;  %v375_v17 = vld [vmem:[#allocation3 + $0x70] ss:$8 sps:$4 sm:$0xff]   ;;  %v74_v37 = vshrl.u32 %v73_v36, 7 }
  0x18   :  { %246 = vmatpush1.bf16.msra.mxu0 %v357_v3  ;;  %v38_v14 = vpack.c.bf16 %v36_v13, %v36_v13  ;;  %v376_v18 = vld [vmem:[#allocation3 + $0x84] ss:$8 sps:$4 sm:$0xff]   ;;  %v378_v19 = vld [vmem:[#allocation3 + $0x80] ss:$8 sps:$4 sm:$0xff]   ;;  %v379_v20 = vld [vmem:[#allocation3 + $0x94] ss:$8 sps:$4 sm:$0xff]  }
  0x19   :  { %247 = vmatprep.subr.bf16.mxu0 %v358_v4  ;;  %v381_v21 = vld [vmem:[#allocation3 + $0x90] ss:$8 sps:$4 sm:$0xff]   ;;  %v382_v22 = vld [vmem:[#allocation3 + $0xa4] ss:$8 sps:$4 sm:$0xff]   ;;  %v384_v23 = vld [vmem:[#allocation3 + $0xa0] ss:$8 sps:$4 sm:$0xff]  }
  0x1a   :  { %275 = vmatprep.mubr.bf16.mxu0 %v38_v14  ;;  %v385_v24 = vld [vmem:[#allocation3 + $0xb4] ss:$8 sps:$4 sm:$0xff]   ;;  %v387_v25 = vld [vmem:[#allocation3 + $0xb0] ss:$8 sps:$4 sm:$0xff]   ;;  %v388_v26 = vld [vmem:[#allocation3 + $0xc4] ss:$8 sps:$4 sm:$0xff]  }
  0x1b   :  { %v390_v27 = vld [vmem:[#allocation3 + $0xc0] ss:$8 sps:$4 sm:$0xff]   ;;  %v391_v28 = vld [vmem:[#allocation3 + $0xd4] ss:$8 sps:$4 sm:$0xff]   ;;  %v393_v29 = vld [vmem:[#allocation3 + $0xd0] ss:$8 sps:$4 sm:$0xff]  }
  0x1c   :  { %248 = vmatpush1.bf16.msra.mxu0 %v360_v5  ;;  %v394_v30 = vld [vmem:[#allocation3 + $0xe4] ss:$8 sps:$4 sm:$0xff]   ;;  %v396_v31 = vld [vmem:[#allocation3 + $0xe0] ss:$8 sps:$4 sm:$0xff]   ;;  %v397_v32 = vld [vmem:[#allocation3 + $0xf4] ss:$8 sps:$4 sm:$0xff]  }
  0x1d   :  { %249 = vmatprep.subr.bf16.mxu0 %v361_v6  ;;  %v399_v33 = vld [vmem:[#allocation3 + $0xf0] ss:$8 sps:$4 sm:$0xff]   ;;  %v35_v34 = vld [vmem:[%s487_s0] sm:$0xff]  ;;  %v75_v38 = vsub.s32 0, %v74_v37  ;;  %v79_v40 = vsub.s32 1, %v74_v37  ;;  %vm310_vm2 = vcmask 7168  }
  0x1e   :  { %v37_v35 = vpack.c.bf16 %v35_v34, %v35_v34  ;;  %v71_v39 = vld [vmem:[%s489_s2] sm:$0x3] }
  0x1f   :  { %v76_v41 = vrot.slane %v71_v39, %v75_v38  ;;  %v80_v42 = vrot.slane %v71_v39, %v79_v40  ;;  %v290_v43 = vld [vmem:[%s490_s3] sm:$0x3] }
  0x20   :  { %250 = vmatpush1.bf16.msra.mxu0 %v363_v7  ;;  %v295_v49 = vrot.slane %v290_v43, %v75_v38  ;;  %v299_v52 = vrot.slane %v290_v43, %v79_v40 }
  0x21   :  { %251 = vmatprep.subr.bf16.mxu0 %v364_v8 }
  0x24   :  { %252 = vmatpush1.bf16.msra.mxu0 %v366_v9 }
  0x25   :  { %253 = vmatprep.subr.bf16.mxu0 %v367_v10 }
  0x28   :  { %254 = vmatpush1.bf16.msra.mxu0 %v369_v11 }
  0x29   :  { %255 = vmatprep.subr.bf16.mxu0 %v370_v12 }
  0x2c   :  { %256 = vmatpush1.bf16.msra.mxu0 %v372_v15 }
  0x2d   :  { %257 = vmatprep.subr.bf16.mxu0 %v373_v16 }
  0x30   :  { %258 = vmatpush1.bf16.msra.mxu0 %v375_v17 }
  0x31   :  { %259 = vmatprep.subr.bf16.mxu0 %v376_v18 }
  0x34   :  { %260 = vmatpush1.bf16.msra.mxu0 %v378_v19 }
  0x35   :  { %261 = vmatprep.subr.bf16.mxu0 %v379_v20 }
  0x38   :  { %262 = vmatpush1.bf16.msra.mxu0 %v381_v21 }
  0x39   :  { %263 = vmatprep.subr.bf16.mxu0 %v382_v22 }
  0x3c   :  { %264 = vmatpush1.bf16.msra.mxu0 %v384_v23 }
  0x3d   :  { %265 = vmatprep.subr.bf16.mxu0 %v385_v24 }
  0x40   :  { %266 = vmatpush1.bf16.msra.mxu0 %v387_v25 }
  0x41   :  { %267 = vmatprep.subr.bf16.mxu0 %v388_v26 }
  0x44   :  { %268 = vmatpush1.bf16.msra.mxu0 %v390_v27 }
  0x45   :  { %269 = vmatprep.subr.bf16.mxu0 %v391_v28 }
  0x48   :  { %270 = vmatpush1.bf16.msra.mxu0 %v393_v29 }
  0x49   :  { %271 = vmatprep.subr.bf16.mxu0 %v394_v30 }
  0x4c   :  { %272 = vmatpush1.bf16.msra.mxu0 %v396_v31 }
  0x4d   :  { %273 = vmatprep.subr.bf16.mxu0 %v397_v32 }
  0x50   :  { %274 = vmatpush1.bf16.msra.mxu0 %v399_v33 }
  0x53   :  { %276 = vmatmul.mubr.bf16.vlgmr.msra.gmra.mrb[0].mxu0 %v37_v35 }
 0x126   :  { %v277_v44 = vpop.f32.mrb[0].mxu0 }
 0x127   :  { %v278_v45 = vadd.f32 %v277_v44, %v76_v41  ;;  %v279_v46 = vpop.f32.mrb[1].mxu0 }
 0x128   :  { %v280_v47 = vadd.f32 %v279_v46, %v80_v42  ;;  %v281_v48 = vpop.f32.mrb[2].mxu0 }
 0x129   :  { %vm284_vm0 = vcmp.gt.f32.partialorder %v278_v45, 0.0  ;;  %v286_v50 = vmul.f32 0.01, %v278_v45  ;;  %v282_v51 = vpop.f32.mrb[3].mxu0 }
 0x12a   :  { %vm285_vm1 = vcmp.gt.f32.partialorder %v280_v47, 0.0  ;;  %v287_v53 = vmul.f32 0.01, %v280_v47 }
 0x12b   :  { %v288_v54 = vsel %vm284_vm0, %v278_v45, %v286_v50 }
 0x12c   :  { %v289_v55 = vsel %vm285_vm1, %v280_v47, %v287_v53  ;;  %v302_v56 = vmul.f32 %v295_v49, %v288_v54 }
 0x12d   :  { %v303_v57 = vmul.f32 %v299_v52, %v289_v55 }
 0x12f   :  { %v304_v58 = vadd.f32 %v303_v57, %v302_v56 }
 0x131   :  { %305 = vadd.xlane.f32.xlu0 %v304_v58 }
 0x1be   :  { %v306_v60 = vpop.xlane.xlu0 %305 }
 0x1bf   :  { %v309_v61 = vadd.f32 %v308_v59, %v306_v60 }
 0x1c1   :  { %311 = vst.msk [vmem:[%s492_s5] sm:$0xff] %vm310_vm2, %v309_v61 }
 0x1c2   :  { %316 = vsyncpa [#allocation4], 1 }

</bundles_post_ra>
